<compile_context>
chip_gen: v7x
topology: tpu7x:2x2x1
jax: 0.10.0
libtpu: 0.0.40
codegen_flags: <defaults>
</compile_context>

<pallas_src>
import functools

import numpy as np

import jax
import jax.numpy as jnp
from jax.experimental import pallas as pl
from jax.experimental.pallas import tpu as pltpu


# ----------------------------- Pallas kernel ------------------------------ #
def _make_cpd_kernel(kh, kw, Wp, Lo):
    """Build the fused CP-conv kernel for static geometry (kh, kw, Wp, Lo)."""
    KK = kh * kw

    def kernel(x_ref, at_ref, bt_ref, c_ref, bias_ref, o_ref, h_ref):
        # x_ref   : (Cin_p, Lh)  bf16  padded image, pixels flattened/lane-dense
        # at_ref  : (Rp, Cin_p)  bf16  A^T (input-channel factor)
        # bt_ref  : (Rp, KK)     f32   depthwise taps; column k = B[k, :]
        # c_ref   : (Cout, Rp)   bf16  output-channel factor
        # bias_ref: (Cout, 1)    f32
        # o_ref   : (Cout, Lo)   bf16  dense stride-1 output at padded flat layout
        # h_ref   : (Rp, Lh)     f32   VMEM scratch, rank intermediate

        # Stage 1: 1x1 conv Cin -> R (lane-dense GEMM, f32 MXU accumulation).
        h_ref[...] = jnp.dot(at_ref[...], x_ref[...],
                             preferred_element_type=jnp.float32)

        # Stage 2: depthwise kh x kw conv.  At the padded stride-1 flat layout
        # tap (i, j) is the constant lane offset d = i*Wp + j, so each tap is a
        # static slice + a per-rank column broadcast multiply (VPU).
        acc = bt_ref[:, 0:1] * h_ref[:, 0:Lo]
        for k in range(1, KK):
            d = (k // kw) * Wp + (k % kw)
            acc = acc + bt_ref[:, k:k + 1] * h_ref[:, d:d + Lo]

        # Stage 3: 1x1 conv R -> Cout (+bias).  Explicit bf16 cast -> guaranteed
        # single-pass bf16 MXU issue with f32 accumulation.
        out = jnp.dot(c_ref[...], acc.astype(jnp.bfloat16),
                      preferred_element_type=jnp.float32)
        o_ref[...] = (out + bias_ref[...]).astype(o_ref.dtype)

    return kernel


# ------------------------------ wrapper ------------------------------------ #
def cpd_conv2d_forward(x, A, B, C, bias, kernel_size, stride, padding,
                       out_dtype=jnp.bfloat16):
    """CP-decomposed conv2d forward.

    x: (N, Cin, H, W) f32, NCHW.
    A: (Cin, R)  B: (kh*kw, R)  C: (Cout, R)  bias: (Cout,).
    Returns (N, Cout, OH, OW) in `out_dtype`.
    """
    kh, kw = kernel_size
    sh, sw = stride
    ph, pw = padding
    N, Cin, H, W = x.shape
    Cout, R = C.shape
    KK = kh * kw

    Hp, Wp = H + 2 * ph, W + 2 * pw
    OH = (Hp - kh) // sh + 1
    OW = (Wp - kw) // sw + 1

    # Lane-dense flat layout: dense (stride-1) output position p = y*Wp + x.
    max_d = (kh - 1) * Wp + (kw - 1)            # largest tap offset
    Lo = pl.cdiv(Hp * Wp, 128) * 128            # output lanes per image
    Lh = pl.cdiv(Lo + max_d, 128) * 128         # intermediate lanes (+ tap halo)

    # Pad channel / rank axes to full sublane groups (8).
    Cin_p = pl.cdiv(Cin, 8) * 8
    Rp = pl.cdiv(R, 8) * 8

    # Input: spatial zero-pad, flatten pixels into lanes, pad channels & lanes.
    xp = jnp.pad(x, ((0, 0), (0, 0), (ph, ph), (pw, pw)))
    x_flat = jnp.pad(xp.reshape(N, Cin, Hp * Wp),
                     ((0, 0), (0, Cin_p - Cin), (0, Lh - Hp * Wp)))
    x_flat = x_flat.astype(jnp.bfloat16)                                 # (N, Cin_p, Lh)

    at = jnp.pad(A.T, ((0, Rp - R), (0, Cin_p - Cin))).astype(jnp.bfloat16)  # (Rp, Cin_p)
    bt = jnp.pad(B.T, ((0, Rp - R), (0, 0))).astype(jnp.float32)             # (Rp, KK)
    cw = jnp.pad(C, ((0, 0), (0, Rp - R))).astype(jnp.bfloat16)              # (Cout, Rp)
    bias_col = bias.reshape(Cout, 1).astype(jnp.float32)

    # Explicit VMEM budget: double-buffered I/O tiles + scratch + weights.
    out_itemsize = np.dtype(out_dtype).itemsize
    budget = (2 * Cin_p * Lh * 2                # x tile, bf16, double-buffered
              + 2 * Cout * Lo * out_itemsize    # output tile, double-buffered
              + Rp * Lh * 4 + Rp * Lo * 4       # h scratch + depthwise accumulator
              + 2 * (Rp * Cin_p * 2 + Rp * KK * 4 + Cout * Rp * 2 + Cout * 4))
    vmem_limit = int(min(64 << 20, max(2 * budget + (1 << 20), 16 << 20)))

    kernel = _make_cpd_kernel(kh, kw, Wp, Lo)
    out = pl.pallas_call(
        kernel,
        out_shape=jax.ShapeDtypeStruct((N, Cout, Lo), out_dtype),
        grid_spec=pltpu.PrefetchScalarGridSpec(
            num_scalar_prefetch=0,
            grid=(N,),
            in_specs=[
                # batch squeezed; last two dims lane-dense / full-array.
                pl.BlockSpec((None, Cin_p, Lh), lambda n: (n, 0, 0)),
                # tiny weights: full-array blocks, resident across the grid.
                pl.BlockSpec((Rp, Cin_p), lambda n: (0, 0)),
                pl.BlockSpec((Rp, KK), lambda n: (0, 0)),
                pl.BlockSpec((Cout, Rp), lambda n: (0, 0)),
                pl.BlockSpec((Cout, 1), lambda n: (0, 0)),
            ],
            out_specs=pl.BlockSpec((None, Cout, Lo), lambda n: (n, 0, 0)),
            scratch_shapes=[pltpu.VMEM((Rp, Lh), jnp.float32)],
        ),
        compiler_params=pltpu.CompilerParams(
            dimension_semantics=("parallel",),
            vmem_limit_bytes=vmem_limit,
        ),
    )(x_flat, at, bt, cw, bias_col)

    # Extract valid (strided) output pixels from the dense padded flat layout.
    out_full = out[:, :, :Hp * Wp].reshape(N, Cout, Hp, Wp)
    return out_full[:, :, ::sh, ::sw][:, :, :OH, :OW]


# --------------------------------- main ------------------------------------ #
if __name__ == "__main__":
    in_channels = 4
    out_channels = 8
    kernel_size = (3, 3)
    stride = (1, 1)
    padding = (1, 1)
    rank = 3

    key = jax.random.PRNGKey(0)
    kx, ka, kb, kc, kbias = jax.random.split(key, 5)

    x = jax.random.normal(kx, (2, in_channels, 16, 16), dtype=jnp.float32)
    A = jax.random.normal(ka, (in_channels, rank), dtype=jnp.float32) * 0.5
    B = jax.random.normal(kb, (kernel_size[0] * kernel_size[1], rank),
                          dtype=jnp.float32) * 0.5
    Cf = jax.random.normal(kc, (out_channels, rank), dtype=jnp.float32) * 0.5
    bias = jax.random.normal(kbias, (out_channels,), dtype=jnp.float32) * 0.1

    fwd = jax.jit(functools.partial(
        cpd_conv2d_forward,
        kernel_size=kernel_size, stride=stride, padding=padding))
    y = jax.block_until_ready(fwd(x, A, B, Cf, bias))
    assert y.shape == (2, out_channels, 16, 16), y.shape
    y32 = jnp.asarray(y, jnp.float32)

    kh, kw = kernel_size
    sh, sw = stride
    ph, pw = padding

    # Reference 1 (tight): replicate the kernel's exact rounding chain in plain
    # JAX (bf16 x/A/C, f32 accumulation, bf16 h2 and bf16 output).
    def ref_quantized(x, A, B, C, bias):
        N, Cin, H, W = x.shape
        OH = (H + 2 * ph - kh) // sh + 1
        OW = (W + 2 * pw - kw) // sw + 1
        xq = x.astype(jnp.bfloat16).astype(jnp.float32)
        xq = jnp.pad(xq, ((0, 0), (0, 0), (ph, ph), (pw, pw)))
        Aq = A.astype(jnp.bfloat16).astype(jnp.float32)
        h = jnp.einsum("ir,nihw->nrhw", Aq, xq)
        h2 = jnp.zeros((N, rank, OH, OW), jnp.float32)
        for i in range(kh):
            for j in range(kw):
                tap = h[:, :, i:i + sh * OH:sh, j:j + sw * OW:sw]
                h2 = h2 + B[i * kw + j][None, :, None, None] * tap
        h2q = h2.astype(jnp.bfloat16).astype(jnp.float32)
        Cq = C.astype(jnp.bfloat16).astype(jnp.float32)
        out = jnp.einsum("or,nrhw->nohw", Cq, h2q) + bias[None, :, None, None]
        return out.astype(jnp.bfloat16).astype(jnp.float32)

    y_ref_q = ref_quantized(x, A, B, Cf, bias)
    assert jnp.allclose(y32, y_ref_q, atol=5e-2, rtol=5e-2), \
        float(jnp.max(jnp.abs(y32 - y_ref_q)))

    # Reference 2 (loose sanity): pure-f32 dense conv with the CP-reconstructed
    # kernel; bf16 roundings only add bf16-level noise.
    W_dense = jnp.einsum("ir,kr,or->oik", A, B, Cf).reshape(
        out_channels, in_channels, kh, kw)
    y_ref = jax.lax.conv_general_dilated(
        x, W_dense, window_strides=stride,
        padding=[(ph, ph), (pw, pw)],
        dimension_numbers=("NCHW", "OIHW", "NCHW"))
    y_ref = y_ref + bias.reshape(1, out_channels, 1, 1)
    assert jnp.allclose(y32, y_ref, atol=1.5e-1, rtol=1.5e-1), \
        float(jnp.max(jnp.abs(y32 - y_ref)))

    print("KERNEL_OK")
</pallas_src>

<mosaic_0001>
module attributes {stable_mosaic.version = 11 : i64} {
  func.func @kernel(%arg0: i32, %arg1: memref<1x8x512xbf16, #tpu.memory_space<vmem>>, %arg2: memref<8x8xbf16, #tpu.memory_space<vmem>>, %arg3: memref<8x9xf32, #tpu.memory_space<vmem>>, %arg4: memref<8x8xbf16, #tpu.memory_space<vmem>>, %arg5: memref<8x1xf32, #tpu.memory_space<vmem>>, %arg6: memref<1x8x384xbf16, #tpu.memory_space<vmem>>, %arg7: memref<8x512xf32, #tpu.memory_space<vmem>>) attributes {dimension_semantics = [#tpu.dimension_semantics<parallel>], iteration_bounds = array<i64: 2>, scalar_prefetch = 0 : i64, scratch_operands = 1 : i64, tpu.core_type = #tpu.core_type<tc>, window_params = [{transform_indices = @transform_0, window_bounds = array<i64: 1, 8, 512>}, {pipeline_mode = #tpu.pipeline_mode<synchronous>, transform_indices = @transform_1, window_bounds = array<i64: 8, 8>}, {pipeline_mode = #tpu.pipeline_mode<synchronous>, transform_indices = @transform_2, window_bounds = array<i64: 8, 9>}, {pipeline_mode = #tpu.pipeline_mode<synchronous>, transform_indices = @transform_3, window_bounds = array<i64: 8, 8>}, {pipeline_mode = #tpu.pipeline_mode<synchronous>, transform_indices = @transform_4, window_bounds = array<i64: 8, 1>}, {transform_indices = @transform_5, window_bounds = array<i64: 1, 8, 384>}]} {
    %c0 = arith.constant 0 : index
    %c0_0 = arith.constant 0 : index
    %0 = vector.load %arg2[%c0, %c0_0] : memref<8x8xbf16, #tpu.memory_space<vmem>>, vector<8x8xbf16>
    %c0_1 = arith.constant 0 : index
    %c0_2 = arith.constant 0 : index
    %c0_3 = arith.constant 0 : index
    %1 = vector.load %arg1[%c0_1, %c0_2, %c0_3] : memref<1x8x512xbf16, #tpu.memory_space<vmem>>, vector<1x8x512xbf16>
    %2 = vector.shape_cast %1 : vector<1x8x512xbf16> to vector<8x512xbf16>
    %cst = arith.constant dense<0.000000e+00> : vector<8x512xf32>
    %3 = tpu.matmul %0, %2, %cst {dimension_numbers = #tpu.dot_dimension_numbers<[1], [0], [0], [1], [0, 0, 1, 1], [], []>} : vector<8x8xbf16>, vector<8x512xbf16>, vector<8x512xf32> -> vector<8x512xf32>
    %c0_4 = arith.constant 0 : index
    %c0_5 = arith.constant 0 : index
    %4 = vector.load %arg7[%c0_4, %c0_5] : memref<8x512xf32, #tpu.memory_space<vmem>>, vector<8x512xf32>
    tpu.vector_store %arg7[%c0_4, %c0_5], %3 {strides = array<i32>} : memref<8x512xf32, #tpu.memory_space<vmem>>, vector<8x512xf32>,
    %c0_6 = arith.constant 0 : index
    %c0_7 = arith.constant 0 : index
    %5 = vector.load %arg3[%c0_6, %c0_7] : memref<8x9xf32, #tpu.memory_space<vmem>>, vector<8x1xf32>
    %c0_8 = arith.constant 0 : index
    %c0_9 = arith.constant 0 : index
    %6 = vector.load %arg7[%c0_8, %c0_9] : memref<8x512xf32, #tpu.memory_space<vmem>>, vector<8x384xf32>
    %7 = vector.broadcast %5 : vector<8x1xf32> to vector<8x384xf32>
    %8 = arith.mulf %7, %6 : vector<8x384xf32>
    %c0_10 = arith.constant 0 : index
    %c1 = arith.constant 1 : index
    %9 = vector.load %arg3[%c0_10, %c1] : memref<8x9xf32, #tpu.memory_space<vmem>>, vector<8x1xf32>
    %c0_11 = arith.constant 0 : index
    %c1_12 = arith.constant 1 : index
    %10 = vector.load %arg7[%c0_11, %c1_12] : memref<8x512xf32, #tpu.memory_space<vmem>>, vector<8x384xf32>
    %11 = vector.broadcast %9 : vector<8x1xf32> to vector<8x384xf32>
    %12 = arith.mulf %11, %10 : vector<8x384xf32>
    %13 = arith.addf %8, %12 : vector<8x384xf32>
    %c0_13 = arith.constant 0 : index
    %c2 = arith.constant 2 : index
    %14 = vector.load %arg3[%c0_13, %c2] : memref<8x9xf32, #tpu.memory_space<vmem>>, vector<8x1xf32>
    %c0_14 = arith.constant 0 : index
    %c2_15 = arith.constant 2 : index
    %15 = vector.load %arg7[%c0_14, %c2_15] : memref<8x512xf32, #tpu.memory_space<vmem>>, vector<8x384xf32>
    %16 = vector.broadcast %14 : vector<8x1xf32> to vector<8x384xf32>
    %17 = arith.mulf %16, %15 : vector<8x384xf32>
    %18 = arith.addf %13, %17 : vector<8x384xf32>
    %c0_16 = arith.constant 0 : index
    %c3 = arith.constant 3 : index
    %19 = vector.load %arg3[%c0_16, %c3] : memref<8x9xf32, #tpu.memory_space<vmem>>, vector<8x1xf32>
    %c0_17 = arith.constant 0 : index
    %c18 = arith.constant 18 : index
    %20 = vector.load %arg7[%c0_17, %c18] : memref<8x512xf32, #tpu.memory_space<vmem>>, vector<8x384xf32>
    %21 = vector.broadcast %19 : vector<8x1xf32> to vector<8x384xf32>
    %22 = arith.mulf %21, %20 : vector<8x384xf32>
    %23 = arith.addf %18, %22 : vector<8x384xf32>
    %c0_18 = arith.constant 0 : index
    %c4 = arith.constant 4 : index
    %24 = vector.load %arg3[%c0_18, %c4] : memref<8x9xf32, #tpu.memory_space<vmem>>, vector<8x1xf32>
    %c0_19 = arith.constant 0 : index
    %c19 = arith.constant 19 : index
    %25 = vector.load %arg7[%c0_19, %c19] : memref<8x512xf32, #tpu.memory_space<vmem>>, vector<8x384xf32>
    %26 = vector.broadcast %24 : vector<8x1xf32> to vector<8x384xf32>
    %27 = arith.mulf %26, %25 : vector<8x384xf32>
    %28 = arith.addf %23, %27 : vector<8x384xf32>
    %c0_20 = arith.constant 0 : index
    %c5 = arith.constant 5 : index
    %29 = vector.load %arg3[%c0_20, %c5] : memref<8x9xf32, #tpu.memory_space<vmem>>, vector<8x1xf32>
    %c0_21 = arith.constant 0 : index
    %c20 = arith.constant 20 : index
    %30 = vector.load %arg7[%c0_21, %c20] : memref<8x512xf32, #tpu.memory_space<vmem>>, vector<8x384xf32>
    %31 = vector.broadcast %29 : vector<8x1xf32> to vector<8x384xf32>
    %32 = arith.mulf %31, %30 : vector<8x384xf32>
    %33 = arith.addf %28, %32 : vector<8x384xf32>
    %c0_22 = arith.constant 0 : index
    %c6 = arith.constant 6 : index
    %34 = vector.load %arg3[%c0_22, %c6] : memref<8x9xf32, #tpu.memory_space<vmem>>, vector<8x1xf32>
    %c0_23 = arith.constant 0 : index
    %c36 = arith.constant 36 : index
    %35 = vector.load %arg7[%c0_23, %c36] : memref<8x512xf32, #tpu.memory_space<vmem>>, vector<8x384xf32>
    %36 = vector.broadcast %34 : vector<8x1xf32> to vector<8x384xf32>
    %37 = arith.mulf %36, %35 : vector<8x384xf32>
    %38 = arith.addf %33, %37 : vector<8x384xf32>
    %c0_24 = arith.constant 0 : index
    %c7 = arith.constant 7 : index
    %39 = vector.load %arg3[%c0_24, %c7] : memref<8x9xf32, #tpu.memory_space<vmem>>, vector<8x1xf32>
    %c0_25 = arith.constant 0 : index
    %c37 = arith.constant 37 : index
    %40 = vector.load %arg7[%c0_25, %c37] : memref<8x512xf32, #tpu.memory_space<vmem>>, vector<8x384xf32>
    %41 = vector.broadcast %39 : vector<8x1xf32> to vector<8x384xf32>
    %42 = arith.mulf %41, %40 : vector<8x384xf32>
    %43 = arith.addf %38, %42 : vector<8x384xf32>
    %c0_26 = arith.constant 0 : index
    %c8 = arith.constant 8 : index
    %44 = vector.load %arg3[%c0_26, %c8] : memref<8x9xf32, #tpu.memory_space<vmem>>, vector<8x1xf32>
    %c0_27 = arith.constant 0 : index
    %c38 = arith.constant 38 : index
    %45 = vector.load %arg7[%c0_27, %c38] : memref<8x512xf32, #tpu.memory_space<vmem>>, vector<8x384xf32>
    %46 = vector.broadcast %44 : vector<8x1xf32> to vector<8x384xf32>
    %47 = arith.mulf %46, %45 : vector<8x384xf32>
    %48 = arith.addf %43, %47 : vector<8x384xf32>
    %c0_28 = arith.constant 0 : index
    %c0_29 = arith.constant 0 : index
    %49 = vector.load %arg4[%c0_28, %c0_29] : memref<8x8xbf16, #tpu.memory_space<vmem>>, vector<8x8xbf16>
    %50 = arith.truncf %48 : vector<8x384xf32> to vector<8x384xbf16>
    %cst_30 = arith.constant dense<0.000000e+00> : vector<8x384xf32>
    %51 = tpu.matmul %49, %50, %cst_30 {dimension_numbers = #tpu.dot_dimension_numbers<[1], [0], [0], [1], [0, 0, 1, 1], [], []>} : vector<8x8xbf16>, vector<8x384xbf16>, vector<8x384xf32> -> vector<8x384xf32>
    %c0_31 = arith.constant 0 : index
    %c0_32 = arith.constant 0 : index
    %52 = vector.load %arg5[%c0_31, %c0_32] : memref<8x1xf32, #tpu.memory_space<vmem>>, vector<8x1xf32>
    %53 = vector.broadcast %52 : vector<8x1xf32> to vector<8x384xf32>
    %54 = arith.addf %51, %53 : vector<8x384xf32>
    %55 = arith.truncf %54 : vector<8x384xf32> to vector<8x384xbf16>
    %c0_33 = arith.constant 0 : index
    %c0_34 = arith.constant 0 : index
    %c0_35 = arith.constant 0 : index
    %56 = vector.load %arg6[%c0_33, %c0_34, %c0_35] : memref<1x8x384xbf16, #tpu.memory_space<vmem>>, vector<1x8x384xbf16>
    %57 = vector.shape_cast %56 : vector<1x8x384xbf16> to vector<8x384xbf16>
    %58 = vector.shape_cast %55 : vector<8x384xbf16> to vector<1x8x384xbf16>
    tpu.vector_store %arg6[%c0_33, %c0_34, %c0_35], %58 {strides = array<i32>} : memref<1x8x384xbf16, #tpu.memory_space<vmem>>, vector<1x8x384xbf16>,
    return
  }
  func.func @transform_0(%arg0: i32) -> (i32, i32, i32) {
    %c0_i32 = arith.constant 0 : i32
    %c0_i32_0 = arith.constant 0 : i32
    %c0_i32_1 = arith.constant 0 : i32
    return %arg0, %c0_i32, %c0_i32_0 : i32, i32, i32
  }
  func.func @transform_1(%arg0: i32) -> (i32, i32) {
    %c0_i32 = arith.constant 0 : i32
    %c0_i32_0 = arith.constant 0 : i32
    %c0_i32_1 = arith.constant 0 : i32
    return %c0_i32, %c0_i32_0 : i32, i32
  }
  func.func @transform_2(%arg0: i32) -> (i32, i32) {
    %c0_i32 = arith.constant 0 : i32
    %c0_i32_0 = arith.constant 0 : i32
    %c0_i32_1 = arith.constant 0 : i32
    return %c0_i32, %c0_i32_0 : i32, i32
  }
  func.func @transform_3(%arg0: i32) -> (i32, i32) {
    %c0_i32 = arith.constant 0 : i32
    %c0_i32_0 = arith.constant 0 : i32
    %c0_i32_1 = arith.constant 0 : i32
    return %c0_i32, %c0_i32_0 : i32, i32
  }
  func.func @transform_4(%arg0: i32) -> (i32, i32) {
    %c0_i32 = arith.constant 0 : i32
    %c0_i32_0 = arith.constant 0 : i32
    %c0_i32_1 = arith.constant 0 : i32
    return %c0_i32, %c0_i32_0 : i32, i32
  }
  func.func @transform_5(%arg0: i32) -> (i32, i32, i32) {
    %c0_i32 = arith.constant 0 : i32
    %c0_i32_0 = arith.constant 0 : i32
    %c0_i32_1 = arith.constant 0 : i32
    return %arg0, %c0_i32, %c0_i32_0 : i32, i32, i32
  }
}

</mosaic_0001>

<bundles_post_ra>
// kernel: cpd_conv2d_forward.1
= control target key start
LH: loop header
LB: loop body
LE: loop exit
PB: predicated region body
PF: predicated region fallthrough
CT: control target
= control target key end

     0   :  { %s903_s18 = smov 0   ;;  %s1014_s0 = inlined_call_operand.vmem [shape: bf16[2,8,512], index: 0, kind: input, shape index: {}]   ;;  %s1015_s1 = inlined_call_operand.vmem [shape: bf16[8,8], index: 1, kind: input, shape index: {}]   ;;  %s1016_s2 = inlined_call_operand.vmem [shape: f32[8,9], index: 2, kind: input, shape index: {}]   ;;  %s1017_s3 = inlined_call_operand.vmem [shape: bf16[8,8], index: 3, kind: input, shape index: {}]   ;;  %s1018_s4 = inlined_call_operand.vmem [shape: f32[8,1], index: 4, kind: input, shape index: {}]   ;;  %s1019_s5 = inlined_call_operand.vmem [shape: bf16[2,8,384], index: 5, kind: output, shape index: {}]  }
   0x1 LB: > { %s771_s19 = sadd.s32 4294967295, %s852_s18   ;;  %p775_p0 = scmp.ge.s32.totalorder %s852_s18, 1  ;;  %s852_s18 = sphi %s903_s18, %s15_s18  }
   0x2   : > { %p187_p1 = scmp.lt.s32.totalorder %s852_s18, 3 }
   0x4   : > { %p188_p2 = pnand %p775_p0, %p187_p1 }
   0x5   : > { %p215_p3 = scmp.lt.s32.totalorder (!%p188_p2), %s771_s19, 1  ;;  %v854_v0 = vmov (!%p188_p2), 0   ;;  %v342_v1 = vld [vmem:[%s1016_s2] sm:$0xff] (!%p188_p2)  ;;  %v855_v2 = vmov (!%p188_p2), 3   ;;  %v856_v3 = vmov (!%p188_p2), 1   ;;  %vm243_vm0 = vcmask (!%p188_p2), 1043456  }
   0x6   : > { %191 = sbr.rel (%p188_p2) target bundleno = 642 (0x282), region = 40  ;;  %288 = vmatprep.mubr.bf16.mxu0 (!%p188_p2), %v854_v0  ;;  %329 = vmatprep.mubr.bf16.mxu1 (!%p188_p2), %v854_v0  ;;  %v857_v10 = vmov (!%p188_p2), 4   ;;  %v858_v11 = vmov (!%p188_p2), 2   ;;  %v226_v14 = vld [vmem:[%s1015_s1] sm:$0xf] (!%p188_p2)  ;;  %vm239_vm1 = vcmask (!%p188_p2), 64512  }
   0x7   : > { %835 = vset.pattern.permute.xlu1 (!%p188_p2), %v855_v2  ;;  %833 = vset.pattern.permute.xlu0 (!%p188_p2), %v856_v3  ;;  %v859_v15 = vmov (!%p188_p2), 5   ;;  %v860_v16 = vmov (!%p188_p2), 6   ;;  %v861_v17 = vmov (!%p188_p2), 7   ;;  %v862_v18 = vmov (!%p188_p2), 8   ;;  %s863_s28 = smov (!%p188_p2), 127   ;;  %s864_s29 = smov (!%p188_p2), 126  }
   0x8   : > { %419 = vperm.xlu1 (!%p188_p2), %835, %v342_v1   ;;  %359 = vperm.xlu0 (!%p188_p2), %833, %v342_v1   ;;  %s865_s30 = smov (!%p188_p2), 110   ;;  %s866_s6 = smov (!%p188_p2), 109   ;;  %v871_v2 = vmov (!%p188_p2), 0.0   ;;  %vm872_vm2 = vmmov (!%p188_p2), 0   ;;  %vm378_vm3 = vcmask (!%p188_p2), 1039360   ;;  %vm408_vm4 = vcmask (!%p188_p2), 1031168  }
   0x9   : > { %s867_s7 = smov (!%p188_p2), 108   ;;  %s868_s8 = smov (!%p188_p2), 92   ;;  %vm438_vm5 = vcmask (!%p188_p2), 900096   ;;  %vm468_vm6 = vcmask (!%p188_p2), 891904   ;;  %vm498_vm7 = vcmask (!%p188_p2), 883712   ;;  %vm528_vm8 = vcmask (!%p188_p2), 752640  }
   0xa   : > { %s869_s9 = smov (!%p188_p2), 91   ;;  %s870_s10 = smov (!%p188_p2), 90   ;;  %vm558_vm9 = vcmask (!%p188_p2), 744448   ;;  %vm588_vm10 = vcmask (!%p188_p2), 736256  }
   0xc   : > { %836 = vset.pattern.permute.xlu1 (!%p188_p2), %v857_v10  ;;  %834 = vset.pattern.permute.xlu0 (!%p188_p2), %v858_v11 }
   0xd   : > { %s1021_s19 = smov (!%p215_p3, %s771_s19), 1  ;;  %449 = vperm.xlu1 %836, %v342_v1   ;;  %389 = vperm.xlu0 %834, %v342_v1  }
   0xe   : > { %s794_s22 = sshll.u32 %s1021_s19, 4  ;;  %s805_s15 = smul.u32 12, %s1021_s19 }
   0xf   : > { %s219_s25 = scalar_lea.vmem %s1014_s0, %s794_s22 }
  0x10   : > { %v227_v4 = vld [vmem:[%s219_s25] sm:$0xff]  ;;  %v228_v5 = vld [vmem:[%s219_s25 + $0x8] sm:$0xff]  ;;  %s224_s20 = scalar_lea.vmem %s1019_s5, %s805_s15 }
  0x11   : > { %v780_v6 = vcombine.high %v227_v4, %v227_v4  ;;  %v782_v7 = vcombine.high %v228_v5, %v228_v5  ;;  %v779_v8 = vcombine.low %v227_v4, %v227_v4  ;;  %v781_v9 = vcombine.low %v228_v5, %v228_v5  ;;  %837 = vset.pattern.permute.xlu1 %v859_v15 }
  0x12   : > { %479 = vperm.xlu1 %837, %v342_v1   ;;  %838 = vset.pattern.permute.xlu0 %v860_v16 }
  0x13   : > { %783 = vmatprep.subr.msk.bf16.mxu0 %vm243_vm0, %v780_v6  ;;  %785 = vmatprep.subr.msk.bf16.mxu1 %vm243_vm0, %v782_v7  ;;  %v245_v12 = vsel %vm243_vm0, %v779_v8, 0  ;;  %v251_v13 = vsel %vm243_vm0, %v781_v9, 0 }
  0x14   : > { %257 = vmatpush1.bf16.msra.mxu0 %v245_v12  ;;  %298 = vmatpush1.bf16.msra.mxu1 %v251_v13 }
  0x15   : > { %509 = vperm.xlu0 %838, %v342_v1   ;;  %799 = vmatprep.subr.bf16.mxu1 %v871_v2 }
  0x16   : > { %839 = vset.pattern.permute.xlu1 %v861_v17 }
  0x17   : > { %784 = vmatmul.mubr.msk.bf16.vlgmr.msra.gmra.mrb[0].mxu0 %vm239_vm1, %v226_v14  ;;  %786 = vmatmul.mubr.msk.bf16.vlgmr.msra.gmra.mrb[0].mxu1 %vm239_vm1, %v226_v14 }
  0x18   : > { %652 = vmatprep.mubr.bf16.mxu0 %v854_v0  ;;  %539 = vperm.xlu1 %839, %v342_v1  }
  0x19   : > { %841 = vset.pattern.permute.xlu0 %v854_v0  ;;  %801 = vmatprep.mubr.msk.bf16.mxu1 %vm872_vm2, %v871_v2 }
  0x1a   : > { %348 = vperm.xlu0 %841, %v342_v1  }
  0x1c   : > { %840 = vset.pattern.permute.xlu1 %v862_v18 }
  0x1d   : > { %569 = vperm.xlu1 %840, %v342_v1   ;;  %v602_v1 = vld [vmem:[%s1018_s4] sm:$0xff] }
  0x87   : > { %v360_v19 = vpop.permute.xlu0 %359  ;;  %v420_v35 = vpop.permute.xlu1 %419 }
  0x8c   : > { %v390_v30 = vpop.permute.xlu0 %389  ;;  %v450_v40 = vpop.permute.xlu1 %449 }
  0x91   : > { %v480_v45 = vpop.permute.xlu1 %479 }
  0x94   : > { %v510_v50 = vpop.permute.xlu0 %509 }
  0x97   : > { %v540_v55 = vpop.permute.xlu1 %539 }
  0x99   : > { %v349_v5 = vpop.permute.xlu0 %348 }
  0x9c   : > { %v570_v60 = vpop.permute.xlu1 %569 }
  0xea   : > { %v929_v20 = vpop.f32.mrb[0].mxu0  ;;  %v931_v21 = vpop.f32.mrb[0].mxu1 }
  0xeb   : > { %v933_v22 = vpop.f32.mrb[1].mxu0  ;;  %v935_v23 = vpop.f32.mrb[1].mxu1  ;;  %v364_v24 = vmul.f32 %v360_v19, %v931_v21  ;;  %v362_v25 = vmul.f32 %v360_v19, %v929_v20  ;;  %v392_v31 = vmul.f32 %v390_v30, %v929_v20  ;;  %v394_v33 = vmul.f32 %v390_v30, %v931_v21 }
  0xec   : > { %v294_v26 = vpop.f32.mrb[2].mxu0  ;;  %v335_v27 = vpop.f32.mrb[2].mxu1  ;;  %v363_v32 = vmul.f32 %v360_v19, %v933_v22  ;;  %v365_v34 = vmul.f32 %v360_v19, %v935_v23  ;;  %v422_v36 = vmul.f32 %v420_v35, %v929_v20  ;;  %v393_v37 = vmul.f32 %v390_v30, %v933_v22 }
  0xed   : > { %374 = vrot.lane.b32.xlu0 %v364_v24, %s863_s28  ;;  %370 = vrot.lane.b32.xlu1 %v362_v25, %s863_s28  ;;  %v295_v28 = vpop.f32.mrb[3].mxu0  ;;  %v336_v29 = vpop.f32.mrb[3].mxu1  ;;  %v424_v38 = vmul.f32 %v420_v35, %v931_v21  ;;  %v395_v39 = vmul.f32 %v390_v30, %v935_v23  ;;  %v452_v41 = vmul.f32 %v450_v40, %v929_v20 }
  0xee   : > { %v423_v42 = vmul.f32 %v420_v35, %v933_v22  ;;  %v454_v43 = vmul.f32 %v450_v40, %v931_v21  ;;  %v425_v44 = vmul.f32 %v420_v35, %v935_v23  ;;  %v482_v46 = vmul.f32 %v480_v45, %v929_v20 }
  0xef   : > { %v453_v47 = vmul.f32 %v450_v40, %v933_v22  ;;  %v484_v48 = vmul.f32 %v480_v45, %v931_v21  ;;  %v455_v49 = vmul.f32 %v450_v40, %v935_v23  ;;  %v512_v51 = vmul.f32 %v510_v50, %v929_v20 }
  0xf0   : > { %v483_v52 = vmul.f32 %v480_v45, %v933_v22  ;;  %v514_v53 = vmul.f32 %v510_v50, %v931_v21  ;;  %v485_v54 = vmul.f32 %v480_v45, %v935_v23  ;;  %v542_v56 = vmul.f32 %v540_v55, %v929_v20 }
  0xf1   : > { %400 = vrot.lane.b32.xlu0 %v392_v31, %s864_s29  ;;  %372 = vrot.lane.b32.xlu1 %v363_v32, %s863_s28  ;;  %v513_v57 = vmul.f32 %v510_v50, %v933_v22  ;;  %v544_v58 = vmul.f32 %v540_v55, %v931_v21  ;;  %v515_v59 = vmul.f32 %v510_v50, %v935_v23 }
  0xf2   : > { %v572_v61 = vmul.f32 %v570_v60, %v929_v20  ;;  %v543_v62 = vmul.f32 %v540_v55, %v933_v22  ;;  %v574_v63 = vmul.f32 %v570_v60, %v931_v21  ;;  %v545_v0 = vmul.f32 %v540_v55, %v935_v23 }
  0xf3   : > { %v573_v3 = vmul.f32 %v570_v60, %v933_v22  ;;  %v575_v4 = vmul.f32 %v570_v60, %v935_v23  ;;  %v351_v35 = vmul.f32 %v349_v5, %v929_v20  ;;  %v353_v20 = vmul.f32 %v349_v5, %v931_v21 }
  0xf5   : > { %404 = vrot.lane.b32.xlu0 %v394_v33, %s864_s29  ;;  %376 = vrot.lane.b32.xlu1 %v365_v34, %s863_s28 }
  0xf9   : > { %430 = vrot.lane.b32.xlu0 %v422_v36, %s865_s30  ;;  %402 = vrot.lane.b32.xlu1 %v393_v37, %s864_s29  ;;  %v352_v36 = vmul.f32 %v349_v5, %v933_v22 }
  0xfd   : > { %434 = vrot.lane.b32.xlu0 %v424_v38, %s865_s30  ;;  %406 = vrot.lane.b32.xlu1 %v395_v39, %s864_s29 }
 0x101   : > { %460 = vrot.lane.b32.xlu0 %v452_v41, %s866_s6  ;;  %432 = vrot.lane.b32.xlu1 %v423_v42, %s865_s30 }
 0x105   : > { %464 = vrot.lane.b32.xlu0 %v454_v43, %s866_s6  ;;  %436 = vrot.lane.b32.xlu1 %v425_v44, %s865_s30 }
 0x109   : > { %490 = vrot.lane.b32.xlu0 %v482_v46, %s867_s7  ;;  %462 = vrot.lane.b32.xlu1 %v453_v47, %s866_s6 }
 0x10d   : > { %494 = vrot.lane.b32.xlu0 %v484_v48, %s867_s7  ;;  %466 = vrot.lane.b32.xlu1 %v455_v49, %s866_s6 }
 0x111   : > { %520 = vrot.lane.b32.xlu0 %v512_v51, %s868_s8  ;;  %492 = vrot.lane.b32.xlu1 %v483_v52, %s867_s7 }
 0x115   : > { %524 = vrot.lane.b32.xlu0 %v514_v53, %s868_s8  ;;  %496 = vrot.lane.b32.xlu1 %v485_v54, %s867_s7 }
 0x119   : > { %550 = vrot.lane.b32.xlu0 %v542_v56, %s869_s9  ;;  %522 = vrot.lane.b32.xlu1 %v513_v57, %s868_s8 }
 0x11d   : > { %554 = vrot.lane.b32.xlu0 %v544_v58, %s869_s9  ;;  %526 = vrot.lane.b32.xlu1 %v515_v59, %s868_s8 }
 0x121   : > { %580 = vrot.lane.b32.xlu0 %v572_v61, %s870_s10  ;;  %552 = vrot.lane.b32.xlu1 %v543_v62, %s869_s9 }
 0x125   : > { %584 = vrot.lane.b32.xlu0 %v574_v63, %s870_s10  ;;  %556 = vrot.lane.b32.xlu1 %v545_v0, %s869_s9 }
 0x129   : > { %605 = vperm.xlu0 %841, %v602_v1   ;;  %582 = vrot.lane.b32.xlu1 %v573_v3, %s870_s10 }
 0x12d   : > { %586 = vrot.lane.b32.xlu1 %v575_v4, %s870_s10 }
 0x15f   : > { %v375_v6 = vpop.permute.xlu0 %374  ;;  %v371_v7 = vpop.permute.xlu1 %370 }
 0x163   : > { %v401_v8 = vpop.permute.xlu0 %400  ;;  %v373_v9 = vpop.permute.xlu1 %372 }
 0x164   : > { %v379_v33 = vsel %vm378_vm3, %v371_v7, %v373_v9  ;;  %v380_v34 = vsel %vm378_vm3, %v373_v9, %v375_v6 }
 0x165   : > { %v385_v39 = vadd.f32 %v379_v33, %v351_v35  ;;  %v386_v40 = vadd.f32 %v380_v34, %v352_v36 }
 0x167   : > { %v405_v10 = vpop.permute.xlu0 %404  ;;  %v377_v11 = vpop.permute.xlu1 %376 }
 0x168   : > { %v381_v43 = vsel %vm378_vm3, %v375_v6, %v377_v11 }
 0x169   : > { %v387_v50 = vadd.f32 %v381_v43, %v353_v20 }
 0x16b   : > { %v431_v12 = vpop.permute.xlu0 %430  ;;  %v403_v13 = vpop.permute.xlu1 %402 }
 0x16c   : > { %v409_v37 = vsel %vm408_vm4, %v401_v8, %v403_v13  ;;  %v410_v38 = vsel %vm408_vm4, %v403_v13, %v405_v10 }
 0x16d   : > { %v415_v46 = vadd.f32 %v409_v37, %v385_v39  ;;  %v416_v22 = vadd.f32 %v410_v38, %v386_v40 }
 0x16f   : > { %v435_v14 = vpop.permute.xlu0 %434  ;;  %v407_v15 = vpop.permute.xlu1 %406 }
 0x170   : > { %v411_v47 = vsel %vm408_vm4, %v405_v10, %v407_v15 }
 0x171   : > { %v417_v56 = vadd.f32 %v411_v47, %v387_v50 }
 0x173   : > { %v461_v16 = vpop.permute.xlu0 %460  ;;  %v433_v17 = vpop.permute.xlu1 %432 }
 0x174   : > { %v439_v44 = vsel %vm438_vm5, %v431_v12, %v433_v17  ;;  %v440_v45 = vsel %vm438_vm5, %v433_v17, %v435_v14 }
 0x175   : > { %v445_v51 = vadd.f32 %v439_v44, %v415_v46  ;;  %v446_v52 = vadd.f32 %v440_v45, %v416_v22 }
 0x177   : > { %v465_v18 = vpop.permute.xlu0 %464  ;;  %v437_v19 = vpop.permute.xlu1 %436 }
 0x178   : > { %v441_v54 = vsel %vm438_vm5, %v435_v14, %v437_v19 }
 0x179   : > { %v447_v63 = vadd.f32 %v441_v54, %v417_v56 }
 0x17b   : > { %v491_v24 = vpop.permute.xlu0 %490  ;;  %v463_v25 = vpop.permute.xlu1 %462 }
 0x17c   : > { %v469_v48 = vsel %vm468_vm6, %v461_v16, %v463_v25  ;;  %v470_v49 = vsel %vm468_vm6, %v463_v25, %v465_v18 }
 0x17d   : > { %v475_v57 = vadd.f32 %v469_v48, %v445_v51  ;;  %v476_v58 = vadd.f32 %v470_v49, %v446_v52 }
 0x17f   : > { %v495_v26 = vpop.permute.xlu0 %494  ;;  %v467_v23 = vpop.permute.xlu1 %466 }
 0x180   : > { %v471_v60 = vsel %vm468_vm6, %v465_v18, %v467_v23 }
 0x181   : > { %v477_v6 = vadd.f32 %v471_v60, %v447_v63 }
 0x183   : > { %v521_v27 = vpop.permute.xlu0 %520  ;;  %v493_v28 = vpop.permute.xlu1 %492 }
 0x184   : > { %v499_v55 = vsel %vm498_vm7, %v491_v24, %v493_v28  ;;  %v500_v21 = vsel %vm498_vm7, %v493_v28, %v495_v26 }
 0x185   : > { %v505_v0 = vadd.f32 %v499_v55, %v475_v57  ;;  %v506_v1 = vadd.f32 %v500_v21, %v476_v58 }
 0x187   : > { %v525_v29 = vpop.permute.xlu0 %524  ;;  %v497_v30 = vpop.permute.xlu1 %496 }
 0x188   : > { %v501_v3 = vsel %vm498_vm7, %v495_v26, %v497_v30 }
 0x189   : > { %v507_v10 = vadd.f32 %v501_v3, %v477_v6 }
 0x18b   : > { %v551_v31 = vpop.permute.xlu0 %550  ;;  %v523_v32 = vpop.permute.xlu1 %522 }
 0x18c   : > { %v529_v61 = vsel %vm528_vm8, %v521_v27, %v523_v32  ;;  %v530_v62 = vsel %vm528_vm8, %v523_v32, %v525_v29 }
 0x18d   : > { %v535_v7 = vadd.f32 %v529_v61, %v505_v0  ;;  %v536_v8 = vadd.f32 %v530_v62, %v506_v1 }
 0x18f   : > { %v555_v41 = vpop.permute.xlu0 %554  ;;  %v527_v42 = vpop.permute.xlu1 %526 }
 0x190   : > { %v531_v9 = vsel %vm528_vm8, %v525_v29, %v527_v42 }
 0x191   : > { %v537_v18 = vadd.f32 %v531_v9, %v507_v10 }
 0x193   : > { %v553_v53 = vpop.permute.xlu1 %552  ;;  %v581_v59 = vpop.permute.xlu0 %580 }
 0x194   : > { %v559_v4 = vsel %vm558_vm9, %v551_v31, %v553_v53  ;;  %v560_v5 = vsel %vm558_vm9, %v553_v53, %v555_v41  ;;  %v598_v31 = vld [vmem:[%s1017_s3] sm:$0xf] }
 0x195   : > { %v565_v11 = vadd.f32 %v559_v4, %v535_v7  ;;  %v566_v12 = vadd.f32 %v560_v5, %v536_v8 }
 0x197   : > { %v557_v2 = vpop.permute.xlu1 %556  ;;  %v585_v13 = vpop.permute.xlu0 %584 }
 0x198   : > { %v561_v15 = vsel %vm558_vm9, %v555_v41, %v557_v2 }
 0x199   : > { %v567_v25 = vadd.f32 %v561_v15, %v537_v18 }
 0x19b   : > { %v583_v14 = vpop.permute.xlu1 %582 }
 0x19c   : > { %v589_v16 = vsel %vm588_vm10, %v581_v59, %v583_v14  ;;  %v590_v17 = vsel %vm588_vm10, %v583_v14, %v585_v13 }
 0x19d   : > { %v595_v19 = vadd.f32 %v589_v16, %v565_v11  ;;  %v596_v24 = vadd.f32 %v590_v17, %v566_v12 }
 0x19f   : > { %v599_v26 = vpack.c.bf16 %v595_v19, %v595_v19  ;;  %v600_v23 = vpack.c.bf16 %v596_v24, %v596_v24  ;;  %v587_v27 = vpop.permute.xlu1 %586 }
 0x1a0   : > { %v591_v28 = vsel %vm588_vm10, %v585_v13, %v587_v27 }
 0x1a1   : > { %v597_v29 = vadd.f32 %v591_v28, %v567_v25  ;;  %787 = vmatprep.subr.msk.bf16.mxu0 %vm243_vm0, %v600_v23  ;;  %v612_v30 = vsel %vm243_vm0, %v599_v26, 0 }
 0x1a2   : > { %621 = vmatpush1.bf16.msra.mxu0 %v612_v30 }
 0x1a3   : > { %v601_v32 = vpack.c.bf16 %v597_v29, %v597_v29 }
 0x1a5   : > { %788 = vmatmul.mubr.msk.bf16.vlgmr.msra.gmra.mrb[4].mxu0 %vm239_vm1, %v598_v31  ;;  %v618_v33 = vsel %vm243_vm0, %v601_v32, 0 }
 0x1a6   : > { %800 = vmatpush3.bf16.msra.mxu1 %v618_v33 }
 0x1a8   : > { %v606_v34 = vpop.permute.xlu0 %605 }
 0x1a9   : > { %802 = vmatmul.mubr.msk.bf16.vlgmr.msra.gmra.mrb[4].mxu1 %vm239_vm1, %v598_v31 }
 0x278   : > { %v654_v35 = vpop.f32.mrb[4].mxu0 }
 0x279   : > { %v655_v36 = vadd.f32 %v654_v35, %v606_v34  ;;  %v656_v37 = vpop.f32.mrb[5].mxu0 }
 0x27a   : > { %v657_v38 = vadd.f32 %v656_v37, %v606_v34  ;;  %v658_v39 = vpop.f32.mrb[6].mxu0 }
 0x27b   : > { %v659_v40 = vpop.f32.mrb[7].mxu0 }
 0x27c   : > { %v795_v41 = vpack.c.bf16 %v657_v38, %v655_v36  ;;  %v695_v42 = vpop.f32.mrb[4].mxu1 }
 0x27d   : > { %v696_v43 = vadd.f32 %v695_v42, %v606_v34  ;;  %v803_v44 = vpop.f32.mrb[5].mxu1 }
 0x27e   : > { %714 = vst [vmem:[%s224_s20] sm:$0xff] %v795_v41  ;;  %v698_v45 = vpop.f32.mrb[6].mxu1 }
 0x27f   : > { %v796_v20 = vpack.c.bf16 %v696_v43, %v696_v43  ;;  %v804_v46 = vpop.f32.mrb[7].mxu1 }
 0x281   : > { %715 = vst [vmem:[%s224_s20 + $0x8] sm:$0xf] %v796_v20 }
 0x282 PF: > { %s15_s18 = sadd.s32 1, %s852_s18  }
 0x283   : > { %p12_p4 = scmp.ge.s32.totalorder %s15_s18, 4  }
 0x285   :  { %14 = sbr.rel (!%p12_p4) target bundleno = 1 (0x1), region = 70 }

</bundles_post_ra>
